<compile_context>
chip_gen: v5e
topology: v5e:2x2
jax: 0.10.0
libtpu: 0.0.40
codegen_flags: <defaults>
</compile_context>

<pallas_src>
import functools

import jax
import jax.numpy as jnp
from jax import lax
from jax.experimental import pallas as pl
from jax.experimental.pallas import tpu as pltpu

_LANE = 128
_SUBLANE = 8


# --------------------------------- helpers ----------------------------------

def _round_up(x: int, m: int) -> int:
    return (x + m - 1) // m * m


def _vmem_limit_bytes() -> int:
    """Generation-aware VMEM limit: 75% of physical capacity.

    v7x (64 MiB physical) -> 48 MiB; v5e/v6e (128 MiB) -> 96 MiB.
    """
    cap = 64 * 1024 * 1024                      # conservative fallback (v7x)
    try:
        cap = int(pltpu.get_tpu_info().vmem_capacity_bytes)
    except Exception:
        pass
    return (cap * 3) // 4


def _num_tensorcores() -> int:
    """Best-effort TensorCore count of the local device (v7x has 2)."""
    try:
        dev = jax.devices()[0]
    except Exception:
        return 1
    for attr in ("num_cores", "core_count"):
        n = getattr(dev, attr, None)
        if isinstance(n, int) and n >= 1:
            return n
    return 1


def _default_num_panels(m: int) -> int:
    """Split Gram rows into 2 panels (leading 'parallel' axis -> both v7x TCs)
    only when the problem is compute-bound enough to pay for the extra RHS read."""
    if m >= 512 and m % (2 * _SUBLANE) == 0 and _num_tensorcores() >= 2:
        return 2
    return 1


def _pick_tk(feat_rows: int, k: int, itemsize: int,
             vmem_limit: int, resident_bytes: int) -> int:
    """Widest lane-aligned K tile whose double-buffered (rows, tk) tiles fit
    (vmem_limit - residents), capped so the K grid keeps ~8+ steps."""
    per_lane = 2 * _round_up(feat_rows, _SUBLANE) * itemsize   # 2 pipeline bufs
    budget = max(vmem_limit - resident_bytes - (2 << 20), per_lane * _LANE)
    tk = (budget // per_lane) // _LANE * _LANE
    tk = max(_LANE, tk)
    tk = min(tk, _round_up(-(-k // 8), _LANE))                 # >= ~8 K steps
    tk = min(tk, _round_up(k, _LANE))                          # <= padded K
    return max(_LANE, int(tk))


def _mask_tail(f, valid_cols: int):
    """Zero columns >= valid_cols. Only ever invoked on the tail K step."""
    col = lax.broadcasted_iota(jnp.int32, f.shape, len(f.shape) - 1)
    return jnp.where(col < valid_cols, f, jnp.zeros_like(f))


def _ff_t(lhs, rhs):
    """lhs @ rhs.T via dot_general (contract last dims) with f32 accumulation."""
    return lax.dot_general(lhs, rhs,
                           dimension_numbers=(((1,), (1,)), ((), ())),
                           preferred_element_type=jnp.float32)


# ----------------------------- Gram matrix kernel -----------------------------

def _gram_kernel(f_ref, g_ref, *, scale, k_total, tk):
    kidx = pl.program_id(0)
    last = pl.num_programs(0) - 1
    valid_tail = k_total - (pl.cdiv(k_total, tk) - 1) * tk     # python int

    @pl.when(kidx == 0)
    def _():
        g_ref[...] = jnp.zeros_like(g_ref)

    if k_total % tk != 0:
        @pl.when(kidx != last)                 # plain MXU path: no mask filler
        def _():
            f = f_ref[...]
            g_ref[...] += _ff_t(f, f)

        @pl.when(kidx == last)                 # ragged tail only
        def _():
            f = _mask_tail(f_ref[...], valid_tail)
            g_ref[...] += _ff_t(f, f)
    else:
        f = f_ref[...]
        g_ref[...] += _ff_t(f, f)

    @pl.when(kidx == last)
    def _():
        g_ref[...] = g_ref[...] * scale


def gram_matrix(x: jax.Array, *, tk: int | None = None,
                compute_dtype=None) -> jax.Array:
    """Pallas gram matrix of an NCHW tensor. Returns (N*C, N*C) float32."""
    a, b, c, d = x.shape
    m = a * b
    k = c * d
    feats = x.reshape(m, k)                                    # layout glue only
    if compute_dtype is not None and feats.dtype != compute_dtype:
        feats = feats.astype(compute_dtype)

    vmem_limit = _vmem_limit_bytes()
    resident = 2 * _round_up(m, _SUBLANE) * _round_up(m, _LANE) * 4
    if tk is None:
        tk = _pick_tk(m, k, feats.dtype.itemsize, vmem_limit, resident)

    kernel = functools.partial(_gram_kernel, scale=1.0 / (a * b * c * d),
                               k_total=k, tk=tk)
    return pl.pallas_call(
        kernel,
        out_shape=jax.ShapeDtypeStruct((m, m), jnp.float32),
        grid_spec=pltpu.PrefetchScalarGridSpec(
            num_scalar_prefetch=0,
            grid=(pl.cdiv(k, tk),),
            in_specs=[pl.BlockSpec((m, tk), lambda j: (0, j))],
            out_specs=pl.BlockSpec((m, m), lambda j: (0, 0)),
        ),
        compiler_params=pltpu.CompilerParams(
            dimension_semantics=("arbitrary",),
            vmem_limit_bytes=vmem_limit),
    )(feats)


# ---------------------- Fused gram + MSE-vs-target kernel ----------------------

def _style_loss_kernel(f_ref, t_hbm_ref, loss_ref, acc_ref, t_vmem_ref, t_sem,
                       *, scale, inv_elems, k_total, tk, tm, num_panels):
    i = pl.program_id(0)                       # row panel (parallel axis)
    kidx = pl.program_id(1)                    # K reduction step
    last = pl.num_programs(1) - 1
    valid_tail = k_total - (pl.cdiv(k_total, tk) - 1) * tk     # python int

    row0 = i * tm
    if num_panels > 1:
        row0 = pl.multiple_of(row0, _SUBLANE)

    def target_copy():
        return pltpu.make_async_copy(t_hbm_ref.at[pl.ds(row0, tm)],
                                     t_vmem_ref, t_sem.at[0])

    @pl.when(kidx == 0)
    def _():
        acc_ref[...] = jnp.zeros_like(acc_ref)
        target_copy().start()                  # overlapped with the whole K sweep

    def accum(masked):
        f = f_ref[...]
        if masked:
            f = _mask_tail(f, valid_tail)
        if num_panels == 1:
            lhs = f
        else:
            lhs = f_ref[pl.ds(row0, tm), :]
            if masked:
                lhs = _mask_tail(lhs, valid_tail)
        acc_ref[...] += _ff_t(lhs, f)

    if k_total % tk != 0:
        @pl.when(kidx != last)                 # mask-free steady state
        def _():
            accum(False)

        @pl.when(kidx == last)                 # masked tail step only
        def _():
            accum(True)
    else:
        accum(False)

    @pl.when(kidx == last)
    def _():
        target_copy().wait()
        diff = acc_ref[...] * scale - t_vmem_ref[...]
        val = jnp.sum(diff * diff) * inv_elems
        if num_panels == 1:
            loss_ref[0, 0] = val               # (1, 1) SMEM scalar output
        else:                                  # per-panel partial (VMEM block)
            loss_ref[...] = jnp.zeros(loss_ref.shape, loss_ref.dtype) + val


def style_loss(x: jax.Array, target_gram: jax.Array, *, tk: int | None = None,
               num_m_panels: int | None = None, compute_dtype=None) -> jax.Array:
    """MSE(gram_matrix(x), target_gram) as a single fused Pallas kernel."""
    a, b, c, d = x.shape
    m = a * b
    k = c * d
    feats = x.reshape(m, k)                                    # layout glue only
    if compute_dtype is not None and feats.dtype != compute_dtype:
        feats = feats.astype(compute_dtype)    # optional bf16 streaming
    if target_gram.dtype != jnp.float32:
        target_gram = target_gram.astype(jnp.float32)

    p = num_m_panels if num_m_panels is not None else _default_num_panels(m)
    if p < 1 or m % p != 0 or (p > 1 and (m // p) % _SUBLANE != 0):
        p = 1
    tm = m // p

    vmem_limit = _vmem_limit_bytes()
    # Residents per core: f32 accumulator + target-row scratch (no double-buffer).
    resident = 2 * _round_up(tm, _SUBLANE) * _round_up(m, _LANE) * 4
    if tk is None:
        tk = _pick_tk(m, k, feats.dtype.itemsize, vmem_limit, resident)

    kernel = functools.partial(
        _style_loss_kernel, scale=1.0 / (a * b * c * d), inv_elems=1.0 / (m * m),
        k_total=k, tk=tk, tm=tm, num_panels=p)

    if p == 1:
        out_shape = jax.ShapeDtypeStruct((1, 1), jnp.float32)
        out_spec = pl.BlockSpec(memory_space=pltpu.MemorySpace.SMEM)
    else:
        out_shape = jax.ShapeDtypeStruct((p, 1, _LANE), jnp.float32)
        out_spec = pl.BlockSpec((1, 1, _LANE), lambda i, j: (i, 0, 0))

    out = pl.pallas_call(
        kernel,
        out_shape=out_shape,
        grid_spec=pltpu.PrefetchScalarGridSpec(
            num_scalar_prefetch=0,
            grid=(p, pl.cdiv(k, tk)),
            in_specs=[
                pl.BlockSpec((m, tk), lambda i, j: (0, j)),    # streamed features
                pl.BlockSpec(memory_space=pl.ANY),             # target (manual DMA)
            ],
            out_specs=out_spec,
            scratch_shapes=[
                pltpu.VMEM((tm, m), jnp.float32),   # panel-rows Gram accumulator
                pltpu.VMEM((tm, m), jnp.float32),   # target rows, background DMA
                pltpu.SemaphoreType.DMA((1,)),
            ]),
        compiler_params=pltpu.CompilerParams(
            dimension_semantics=("parallel", "arbitrary"),
            vmem_limit_bytes=vmem_limit),
    )(feats, target_gram)

    if p == 1:
        return out[0, 0]
    return jnp.sum(out[:, 0, 0])               # combine per-panel partial losses


# ------------------------------ StyleLoss module -------------------------------

class StyleLoss:
    """JAX/Pallas port of the PyTorch StyleLoss module."""

    def __init__(self, target_feature: jax.Array, *, compute_dtype=None):
        self.compute_dtype = compute_dtype
        self.target = gram_matrix(target_feature, compute_dtype=compute_dtype)
        self.loss = None

    def __call__(self, x: jax.Array) -> jax.Array:
        # Single fused kernel: gram(x) + MSE vs target, no HBM round-trip of G.
        self.loss = style_loss(x, self.target, compute_dtype=self.compute_dtype)
        return x  # passthrough, identical to the PyTorch forward


# ----------------------------------- main --------------------------------------

if __name__ == "__main__":
    key = jax.random.PRNGKey(0)
    k_tgt, k_in, k_tgt2, k_in2, k_tgt3, k_in3 = jax.random.split(key, 6)

    def _ref_gram(t):
        a, b, c, d = t.shape
        f = t.reshape(a * b, c * d).astype(jnp.float32)
        return (f @ f.T) / (a * b * c * d)

    def _ref_loss(xi, tf):
        return jnp.mean((_ref_gram(xi) - _ref_gram(tf)) ** 2)

    # 1) Module-level check at the spec's small NCHW shape.
    target_feature = jax.random.normal(k_tgt, (2, 4, 16, 16), dtype=jnp.float32)
    x = jax.random.normal(k_in, (2, 4, 16, 16), dtype=jnp.float32)
    module = StyleLoss(target_feature)
    out = jax.block_until_ready(module(x))
    loss = jax.block_until_ready(module.loss)
    assert jnp.allclose(loss, _ref_loss(x, target_feature), rtol=1e-4, atol=0.0)
    assert jnp.allclose(module.target, _ref_gram(target_feature),
                        rtol=1e-5, atol=1e-6)
    assert jnp.array_equal(out, x)

    # 2) Ragged K (H*W not a multiple of 128) -> exercises the gated tail mask.
    tf2 = jax.random.normal(k_tgt2, (2, 4, 10, 13), dtype=jnp.float32)
    x2 = jax.random.normal(k_in2, (2, 4, 10, 13), dtype=jnp.float32)
    m2 = StyleLoss(tf2)
    jax.block_until_ready(m2(x2))
    assert jnp.allclose(m2.loss, _ref_loss(x2, tf2), rtol=1e-4, atol=0.0)

    # 3) Multi-row-panel path (used to engage both TensorCores on v7x).
    tf3 = jax.random.normal(k_tgt3, (1, 16, 16, 24), dtype=jnp.float32)
    x3 = jax.random.normal(k_in3, (1, 16, 16, 24), dtype=jnp.float32)
    tgt3 = gram_matrix(tf3)
    loss3 = jax.block_until_ready(style_loss(x3, tgt3, num_m_panels=2))
    assert jnp.allclose(loss3, _ref_loss(x3, tf3), rtol=1e-4, atol=0.0)

    # 4) Optional bf16 feature streaming (halved HBM bytes, bf16 MXU path).
    loss_bf16 = jax.block_until_ready(
        style_loss(x, module.target, compute_dtype=jnp.bfloat16))
    assert jnp.allclose(loss_bf16, _ref_loss(x, target_feature),
                        rtol=1e-1, atol=1e-3)

    print("KERNEL_OK")
</pallas_src>

<mosaic_0001>
module attributes {stable_mosaic.version = 11 : i64} {
  func.func @_gram_kernel(%arg0: i32, %arg1: memref<8x128xf32, #tpu.memory_space<vmem>>, %arg2: memref<8x8xf32, #tpu.memory_space<vmem>>) attributes {dimension_semantics = [#tpu.dimension_semantics<arbitrary>], iteration_bounds = array<i64: 2>, scalar_prefetch = 0 : i64, scratch_operands = 0 : i64, tpu.core_type = #tpu.core_type<tc>, window_params = [{transform_indices = @transform_0, window_bounds = array<i64: 8, 128>}, {pipeline_mode = #tpu.pipeline_mode<synchronous>, transform_indices = @transform_1, window_bounds = array<i64: 8, 8>}]} {
    %c0_i32 = arith.constant 0 : i32
    %0 = arith.cmpi eq, %arg0, %c0_i32 : i32
    %1 = arith.extui %0 : i1 to i32
    %c0_i32_0 = arith.constant 0 : i32
    %2 = arith.cmpi ne, %1, %c0_i32_0 : i32
    scf.if %2 {
      %cst_7 = arith.constant 0.000000e+00 : f32
      %11 = vector.broadcast %cst_7 : f32 to vector<8x8xf32>
      %c0_8 = arith.constant 0 : index
      %c0_9 = arith.constant 0 : index
      %12 = vector.load %arg2[%c0_8, %c0_9] : memref<8x8xf32, #tpu.memory_space<vmem>>, vector<8x8xf32>
      tpu.vector_store %arg2[%c0_8, %c0_9], %11 {strides = array<i32>} : memref<8x8xf32, #tpu.memory_space<vmem>>, vector<8x8xf32>,
    } else {
    }
    %c0 = arith.constant 0 : index
    %c0_1 = arith.constant 0 : index
    %3 = vector.load %arg1[%c0, %c0_1] : memref<8x128xf32, #tpu.memory_space<vmem>>, vector<8x128xf32>
    %c0_2 = arith.constant 0 : index
    %c0_3 = arith.constant 0 : index
    %4 = vector.load %arg2[%c0_2, %c0_3] : memref<8x8xf32, #tpu.memory_space<vmem>>, vector<8x8xf32>
    %cst = arith.constant dense<0.000000e+00> : vector<8x8xf32>
    %5 = tpu.matmul %3, %3, %cst {dimension_numbers = #tpu.dot_dimension_numbers<[1], [1], [0], [0], [0, 0, 1, 0], [], []>} : vector<8x128xf32>, vector<8x128xf32>, vector<8x8xf32> -> vector<8x8xf32>
    %6 = arith.addf %4, %5 : vector<8x8xf32>
    %c0_4 = arith.constant 0 : index
    %c0_5 = arith.constant 0 : index
    %7 = vector.load %arg2[%c0_4, %c0_5] : memref<8x8xf32, #tpu.memory_space<vmem>>, vector<8x8xf32>
    tpu.vector_store %arg2[%c0_4, %c0_5], %6 {strides = array<i32>} : memref<8x8xf32, #tpu.memory_space<vmem>>, vector<8x8xf32>,
    %c1_i32 = arith.constant 1 : i32
    %8 = arith.cmpi eq, %arg0, %c1_i32 : i32
    %9 = arith.extui %8 : i1 to i32
    %c0_i32_6 = arith.constant 0 : i32
    %10 = arith.cmpi ne, %9, %c0_i32_6 : i32
    scf.if %10 {
      %c0_7 = arith.constant 0 : index
      %c0_8 = arith.constant 0 : index
      %11 = vector.load %arg2[%c0_7, %c0_8] : memref<8x8xf32, #tpu.memory_space<vmem>>, vector<8x8xf32>
      %cst_9 = arith.constant 4.8828125E-4 : f32
      %12 = vector.broadcast %cst_9 : f32 to vector<8x8xf32>
      %13 = arith.mulf %11, %12 : vector<8x8xf32>
      %c0_10 = arith.constant 0 : index
      %c0_11 = arith.constant 0 : index
      %14 = vector.load %arg2[%c0_10, %c0_11] : memref<8x8xf32, #tpu.memory_space<vmem>>, vector<8x8xf32>
      tpu.vector_store %arg2[%c0_10, %c0_11], %13 {strides = array<i32>} : memref<8x8xf32, #tpu.memory_space<vmem>>, vector<8x8xf32>,
    } else {
    }
    return
  }
  func.func @transform_0(%arg0: i32) -> (i32, i32) {
    %c0_i32 = arith.constant 0 : i32
    %c0_i32_0 = arith.constant 0 : i32
    return %c0_i32, %arg0 : i32, i32
  }
  func.func @transform_1(%arg0: i32) -> (i32, i32) {
    %c0_i32 = arith.constant 0 : i32
    %c0_i32_0 = arith.constant 0 : i32
    %c0_i32_1 = arith.constant 0 : i32
    return %c0_i32, %c0_i32_0 : i32, i32
  }
}

</mosaic_0001>

<bundles_post_ra>
// kernel: tpu_custom_call.1
= control target key start
LH: loop header
LB: loop body
LE: loop exit
PB: predicated region body
PF: predicated region fallthrough
CT: control target
= control target key end

     0   :  { %6 = vsyncpa [#allocation3], 0  ;;  %s484_s0 = inlined_call_operand.hbm [shape: f32[8,256], index: 0, kind: input, shape index: {}]   ;;  %s485_s1 = inlined_call_operand.hbm [shape: f32[8,8], index: 1, kind: output, shape index: {}]  }
   0x1   :  { %8 = vsyncpa [#allocation3 + $0x1], 0 }
   0x2   :  { %9 = vsyncpa [#allocation4], 0  ;;  %s389_s6 = smov 0   ;;  %s391_s7 = smov 0  }
   0x3   :  { %s393_s8 = smov 0   ;;  %s395_s9 = smov 0  }
   0x4 LB: > { %s408_s10 = sadd.s32 4294967295, %s375_s9   ;;  %s411_s11 = sadd.s32 1, %s375_s9   ;;  %s375_s9 = sphi %s395_s9, %s492_s9   ;;  %s371_s8 = sphi %s393_s8, %s491_s8   ;;  %s367_s7 = sphi %s391_s7, %s490_s7   ;;  %s363_s6 = sphi %s389_s6, %s489_s6  }
   0x5   : > { %s19_s12 = ssub.s32 %s375_s9, %s411_s11  ;;  %s22_s13 = sadd.s32 1, %s371_s8 }
   0x6   : > { %p20_p0 = scmp.eq.s32.totalorder %s19_s12, 0  ;;  %p29_p1 = scmp.ne.s32.totalorder %s371_s8, %s367_s7 }
   0x7   : > { %p30_p2 = scmp.eq.s32.totalorder %s375_s9, 0  ;;  %p35_p3 = scmp.ne.s32.totalorder %s367_s7, %s363_s6 }
   0x8   : > { %s421_s14 = scalar_select %p20_p0, %s371_s8, %s22_s13  }
   0x9   : > { %p423_p4 = por %p30_p2, %p29_p1  ;;  %p36_p5 = scmp.eq.s32.totalorder %s408_s10, 0 }
   0xa   : > { %p242_p6 = scmp.lt.s32.totalorder %s375_s9, 2  ;;  %s80_s17 = sand.u32 1, %s371_s8  }
   0xb   : > { %p429_p7 = por %p36_p5, %p35_p3  ;;  %s222_s18 = sshll.u32 %s80_s17, 3 }
   0xc   : > { %s223_s19 = sshll.u32 %s375_s9, 3  ;;  %s84_s23 = scalar_lea.vmem [#allocation2], %s222_s18 }
   0xd   : > { %s88_s22 = scalar_lea.hbm %s484_s0, %s223_s19  ;;  %s92_s24 = sshll.u32 %s84_s23, 4  ;;  %s93_s24 = int_to_ptr.vmem [resolvable:$true] %s92_s24 }
   0xe   : > { %s90_s25 = sshll.u32 %s88_s22, 4  ;;  %p440_p8 = pnand %p242_p6, %p423_p4  ;;  %s91_s25 = int_to_ptr.hbm [resolvable:$true] %s90_s25 }
   0xf   : > { %p224_p9 = scmp.ge.s32.totalorder %s375_s9, 1  ;;  %p97_p10 = scmp.lt.s32.totalorder %s375_s9, 3 }
  0x10   : > { %s81_s27 = scalar_lea.sflag [#allocation3], %s80_s17  ;;  %s279_s28 = sshra.s32 %s91_s25, 4  ;;  %s280_s28 = int_to_ptr.hbm [resolvable:$true] %s279_s28 }
  0x11   : > { %s281_s29 = scalar_lea.hbm %s280_s28, 8  ;;  %p283_p12 = pneg %p440_p8 }
  0x12   : > { %p282_p11 = scmp.ne.s32.totalorder %s280_s28, %s281_s29  ;;  %s286_s3 = scalar_lea.hbm %s484_s0, 16 }
  0x13   : > { %p287_p1 = scmp.lt.s32.totalorder %s280_s28, %s484_s0  ;;  %p288_p2 = scmp.lt.s32.totalorder %s286_s3, %s281_s29 }
  0x14   : > { %p284_p13 = pnand %p283_p12, %p282_p11 }
  0x15   : > { %p289_p3 = por %p288_p2, %p287_p1 }
  0x16   : > { %p285_p0 = pneg %p284_p13 }
  0x18   : > { %p290_p4 = pnand %p289_p3, %p285_p0 }
  0x1a   : > { %293 = shalt.err (!%p290_p4)
}
  0x1b   : > { %241 = dma.hbm_to_vmem [thread:$0]  (!%p440_p8), %s91_s25, 128, %s93_s24, %s81_s27  }
  0x1c   : > { %p98_p5 = pnand %p224_p9, %p97_p10 }
  0x1d   : > { %s103_s6 = sand.u32 (!%p98_p5), 1, %s367_s7  }
  0x1e   : > { %101 = sbr.rel (%p98_p5) target bundleno = 193 (0xc1), region = 24  ;;  %s225_s12 = sshll.u32 (!%p98_p5), %s103_s6, 3 }
  0x1f   : > { %s104_s13 = scalar_lea.sflag (!%p98_p5), [#allocation3], %s103_s6  ;;  %s107_s15 = scalar_lea.vmem (!%p98_p5), [#allocation2], %s225_s12 }
  0x23   : > { %354 = dma.done.wait (%p429_p7), %s104_s13, 128  }
  0x24   : > { %356 = vsyncadd (%p429_p7), %s104_s13, 4294967168  ;;  %p226_p6 = scmp.ne.s32.totalorder %s408_s10, 0 }
  0x26   : > { %125 = sbr.rel (%p226_p6) target bundleno = 45 (0x2d), region = 32 }
  0x2b   : > { %vm126_vm0 = vcmask 64512   ;;  %v377_v0 = vmov 0.0  }
  0x2c   : > { %127 = vst.msk [vmem:[#allocation5] sm:$0xff] %vm126_vm0, %v377_v0 }
  0x2d PF: > { %v128_v1 = vld [vmem:[%s107_s15] sm:$0xff]  ;;  %vm151_vm1 = vcmask 64512   ;;  %p227_p8 = scmp.ne.s32.totalorder %s408_s10, 1 }
  0x2e   : > { %145 = vmatpush.xpose.msra.mxu0 %v128_v1 }
  0x31   : > { %146 = vmatmul.f32.vlgmr.msra.gmra.mxu0 %v128_v1 }
  0x33   : > { %v129_v2 = vld [vmem:[#allocation5] sm:$0xff] }
  0xad   : > { %156 = sbr.rel (%p227_p8) target bundleno = 188 (0xbc), region = 36 }
  0xae   : > { %v147_v3 = vpop.f32.mrf.mxu0 }
  0xaf   : > { %v150_v4 = vadd.f32 %v147_v3, %v129_v2 }
  0xb1   : > { %152 = vst.msk [vmem:[#allocation5] sm:$0xff] %vm151_vm1, %v150_v4 }
  0xb8   : > { %v157_v5 = vld [vmem:[#allocation5] sm:$0xff] }
  0xb9   : > { %v158_v6 = vmul.f32 0.00048828125, %v157_v5 }
  0xbb   : > { %159 = vst.msk [vmem:[#allocation5] sm:$0xff] %vm151_vm1, %v158_v6 }
  0xbc PF: > { %p243_p7 = scmp.eq.s32.totalorder %s408_s10, 1  ;;  %s378_s9 = smov [#allocation5]  }
  0xbd   : > { %s166_s16 = sshll.u32 %s378_s9, 4  ;;  %s168_s19 = sshll.u32 %s485_s1, 4  ;;  %s167_s16 = int_to_ptr.vmem [resolvable:$true] %s166_s16  ;;  %s169_s19 = int_to_ptr.hbm [resolvable:$true] %s168_s19 }
  0xbe   : > { %235 = dma.vmem_to_hbm [thread:$0]  (%p243_p7), %s167_s16, 128, %s169_s19, [#allocation4]  }
  0xbf   : > { %358 = dma.done.wait (%p243_p7), [#allocation4], 128  }
  0xc0   : > { %360 = vsyncadd (%p243_p7), [#allocation4], 4294967168 }
  0xc1 PF: > { %p12_p9 = scmp.ge.s32.totalorder %s411_s11, 4   ;;  %s489_s6 = smov %s367_s7 }
  0xc2   : > { %s490_s7 = smov %s371_s8  ;;  %s491_s8 = smov %s421_s14 }
  0xc3   : > { %s492_s9 = smov %s411_s11  ;;  %14 = sbr.rel (!%p12_p9) target bundleno = 4 (0x4), region = 69 }
  0xc8   :  { %182 = vsyncpa [#allocation3], 1 }
  0xc9   :  { %184 = vsyncpa [#allocation3 + $0x1], 1 }
  0xca   :  { %185 = vsyncpa [#allocation4], 1 }
  0xcb   :  { %187 = vsyncpa [#allocation4 + $0x1], 1 }

</bundles_post_ra>
